<compile_context>
chip_gen: v6e
topology: v6e:2x2x1
jax: 0.10.0
libtpu: 0.0.40
codegen_flags: <defaults>
</compile_context>

<pallas_src>
import jax
import jax.numpy as jnp
from jax.experimental import pallas as pl
from jax.experimental.pallas import tpu as pltpu


# ----------------------------------------------------------------------------
# Pallas kernel: conv as a tap-GEMM (bf16 MXU inputs, f32 accumulation)
# ----------------------------------------------------------------------------
def _conv_tap_gemm_kernel(xt_ref, w_ref, b_ref, o_ref):
    # xt_ref: (1, KCp, tt)  compute dtype (bf16 by default)
    # w_ref : (Cout, KCp)   compute dtype (VMEM-resident across the grid)
    # b_ref : (Cout, 1)     f32
    # o_ref : (1, Cout, tt) out dtype (bf16 by default)
    acc = jnp.dot(w_ref[...], xt_ref[0], preferred_element_type=jnp.float32)
    o_ref[0] = (acc + b_ref[...]).astype(o_ref.dtype)


def conv_tap_gemm(xt, w2d, bias, *, tt, out_dtype, vmem_limit_bytes):
    """xt: (B, KCp, T_r), w2d: (Cout, KCp), bias: (Cout,) f32 -> (B, Cout, T_r)."""
    B, KCp, T_r = xt.shape
    Cout = w2d.shape[0]
    assert T_r % tt == 0 and tt % 128 == 0, (T_r, tt)
    nT = T_r // tt
    b2d = bias.reshape(Cout, 1).astype(jnp.float32)

    return pl.pallas_call(
        _conv_tap_gemm_kernel,
        out_shape=jax.ShapeDtypeStruct((B, Cout, T_r), out_dtype),
        grid=(B, nT),
        in_specs=[
            # Streaming input: lane-dense along time (minor dim = tt).
            # (pipeline_mode=pl.Buffered(3) is a further knob if profiling shows
            #  exposed DMA; default depth-2 pipelining kept here for portability.)
            pl.BlockSpec((1, KCp, tt), lambda b, i: (b, 0, i)),
            # Weight / bias revisit block (0, 0) every step -> stay VMEM-resident.
            pl.BlockSpec((Cout, KCp), lambda b, i: (0, 0)),
            pl.BlockSpec((Cout, 1), lambda b, i: (0, 0)),
        ],
        out_specs=pl.BlockSpec((1, Cout, tt), lambda b, i: (b, 0, i)),
        compiler_params=pltpu.CompilerParams(
            dimension_semantics=("parallel", "parallel"),
            vmem_limit_bytes=vmem_limit_bytes,
        ),
    )(xt, w2d, b2d)


# ----------------------------------------------------------------------------
# Module logic (glue in plain JAX, conv compute in the Pallas kernel above)
# ----------------------------------------------------------------------------
def get_tf_pad(kernel_size, stride):
    pad_config, even_pad_config = [], []
    for i in range(len(kernel_size)):
        assert kernel_size[i] % 2 == 1
        p = kernel_size[i] // 2
        pad_config.append([p, p])
        if stride[i] == 2:
            even_pad_config.append([p - 1, p])
        else:
            assert stride[i] == 1
            even_pad_config.append([p, p])
    return pad_config, even_pad_config


def create_pad_mask(lens, max_len):
    return jnp.arange(max_len)[None, :] >= lens[:, None]


def _round_up(x, m):
    return (x + m - 1) // m * m


def _detect_vmem_capacity_bytes():
    # Physical VMEM per TensorCore: 128 MiB on v5e/v6e, 64 MiB on v7x.
    try:
        return int(pltpu.get_tpu_info().vmem_capacity_bytes)
    except Exception:
        return 64 * 1024 * 1024  # conservative fallback (v7x per-TC size)


class ConvPallas:
    """1D variant of SPIRAL `Conv` with use_tf_pad=True, padding='same'."""

    LANE = 128      # lane width; output time is tiled in multiples of this
    TT_CAP = 4096   # upper bound on the time tile (lanes) even when VMEM allows more

    def __init__(self, in_channels, out_channels, kernel_size=(3,), stride=(2,),
                 bias=True, compute_dtype=jnp.bfloat16, out_dtype=jnp.bfloat16,
                 key=jax.random.PRNGKey(0)):
        assert isinstance(kernel_size, tuple) and isinstance(stride, tuple)
        self.in_channels = in_channels
        self.out_channels = out_channels
        self.kernel_size = kernel_size
        self.stride = stride
        self.compute_dtype = compute_dtype   # MXU operand dtype (f32 path available)
        self.out_dtype = out_dtype           # HBM output stream dtype
        self.pad_num, self.even_pad_num = get_tf_pad(kernel_size, stride)
        self.need_pad = kernel_size[0] > 1
        self.need_pad_mask = kernel_size[0] > 1
        self.subsample_factor = stride[0]

        # VMEM budget: 3/4 of detected capacity, clamped; used both for the
        # compiler's scoped-VMEM limit and for deriving the time-tile size.
        cap = _detect_vmem_capacity_bytes()
        self._vmem_limit_bytes = int(min(max(cap * 3 // 4, 32 << 20), 96 << 20))

        # deterministic parameter init (Conv1d weight: (Cout, Cin, K), bias: (Cout,))
        k_w, k_b = jax.random.split(key)
        fan_in = in_channels * kernel_size[0]
        bound = 1.0 / jnp.sqrt(fan_in)
        self.weight = jax.random.uniform(
            k_w, (out_channels, in_channels, kernel_size[0]),
            minval=-bound, maxval=bound, dtype=jnp.float32)
        self.bias = (jax.random.uniform(
            k_b, (out_channels,), minval=-bound, maxval=bound, dtype=jnp.float32)
            if bias else jnp.zeros((out_channels,), jnp.float32))

    # --- helpers ------------------------------------------------------------
    def tf_pad_amounts(self, x):
        # NOTE: faithful to the torch module -- for 1D it checks x.size(-2) parity
        # (which is the CHANNEL dim), so padding depends on channel-count parity.
        if not self.need_pad:
            return 0, 0
        if x.shape[-2] % 2 == 0:
            return tuple(self.even_pad_num[0])
        return tuple(self.pad_num[0])

    def update_out_seq_lens(self, lens):
        s = self.stride[0]
        return (lens + s - 1) // s

    def _tt_max_units(self, kcp, cout):
        """Max time-tile width in 128-lane units from the per-chip VMEM budget."""
        in_b = jnp.dtype(self.compute_dtype).itemsize
        out_b = jnp.dtype(self.out_dtype).itemsize
        # Double-buffered streaming blocks (input taps + output), per output column.
        per_col = 2 * (kcp * in_b + cout * out_b)
        # Resident weight + bias (default pipelining still allocates 2 buffers each).
        fixed = 2 * (cout * kcp * in_b + cout * 4)
        budget = int(self._vmem_limit_bytes * 0.8) - fixed
        units = budget // (per_col * self.LANE)
        return int(max(1, min(units, self.TT_CAP // self.LANE)))

    # --- forward ------------------------------------------------------------
    def __call__(self, x, lens, pad_mask=None):
        # x: (B, Cin, T) float32, lens: (B,) int32, pad_mask: (B, T) bool (True = pad)
        if pad_mask is not None and self.need_pad_mask:
            x = jnp.where(pad_mask[:, None, :], 0.0, x)
        # Early cast: the fused XLA pre-pass (pad + tap-stack) moves bf16, not f32.
        x = x.astype(self.compute_dtype)

        B, Cin, T = x.shape
        K, S = self.kernel_size[0], self.stride[0]
        Cout = self.out_channels
        KC = K * Cin
        KCp = _round_up(KC, 16)   # vreg-dense bf16 sublane packing of the reduce dim

        left, right = self.tf_pad_amounts(x)
        T_tf = T + left + right
        T_out = (T_tf - K) // S + 1

        # ---- time tiling: lane-dense 128-multiples sized from the VMEM budget ----
        units = pl.cdiv(T_out, self.LANE)          # 128-lane units per batch
        u = min(units, self._tt_max_units(KCp, Cout))
        if B == 1 and units >= 2:
            u = min(u, pl.cdiv(units, 2))          # >=2 grid steps for v7x's 2 TCs
        nT = pl.cdiv(units, u)
        u = pl.cdiv(units, nT)                     # rebalance -> less tail padding
        tt = u * self.LANE
        T_out_r = nT * tt                          # >= T_out, multiple of 128

        # ---- fused pre-pass: TF 'same' pad + zero tail covering every tap ----
        T_total = S * T_out_r + K - 1
        x_p = jnp.pad(x, ((0, 0), (0, 0), (left, T_total - T - left)))

        # Tap-stacked input (B, KCp, T_out_r): XT[b, k*Cin + c, t] = x_p[b, c, S*t + k].
        # XLA fuses this strided slice with the mask/cast/pad pass above.
        # TODO(synk): fold the stride-S tap split into the kernel itself -- it needs
        # overlapping / element-offset input blocks (halo of K-S lanes per tile) with
        # no clean BlockSpec expression, so the wrapper still streams ~K/S x the input
        # through HBM once.
        taps = jnp.stack([x_p[:, :, k::S][:, :, :T_out_r] for k in range(K)], axis=1)
        xt = taps.reshape(B, KC, T_out_r)
        if KCp != KC:
            xt = jnp.pad(xt, ((0, 0), (0, KCp - KC), (0, 0)))

        # weight (Cout, Cin, K) -> (Cout, KCp), tap-major to match XT ordering
        w2d = jnp.transpose(self.weight, (0, 2, 1)).reshape(Cout, KC)
        w2d = jnp.pad(w2d, ((0, 0), (0, KCp - KC))).astype(self.compute_dtype)

        out = conv_tap_gemm(xt, w2d, self.bias, tt=tt, out_dtype=self.out_dtype,
                            vmem_limit_bytes=self._vmem_limit_bytes)
        # NOTE: padded tail columns (T_out..T_out_r) hold only the bias; sliced off here.
        out = out[:, :, :T_out]

        if self.subsample_factor > 1:
            lens = self.update_out_seq_lens(lens)
            pad_mask = create_pad_mask(lens, max_len=out.shape[2])
        return out, lens, pad_mask


# ----------------------------------------------------------------------------
if __name__ == "__main__":
    key = jax.random.PRNGKey(0)
    k_x, k_params = jax.random.split(key)

    B, Cin, Cout, T, K, S = 2, 4, 8, 16, 3, 2
    x = jax.random.normal(k_x, (B, Cin, T), dtype=jnp.float32)
    lens = jnp.array([16, 11], dtype=jnp.int32)
    pad_mask_in = create_pad_mask(lens, T)

    conv = ConvPallas(Cin, Cout, kernel_size=(K,), stride=(S,), bias=True,
                      key=k_params)
    fwd = jax.jit(conv.__call__)
    out, out_lens, out_mask = fwd(x, lens, pad_mask_in)
    out = jax.block_until_ready(out)

    # reference: same mask / TF-pad semantics, f32 conv via lax
    x_m = jnp.where(pad_mask_in[:, None, :], 0.0, x)
    rl, rr = conv.tf_pad_amounts(x_m)
    x_ref = jnp.pad(x_m, ((0, 0), (0, 0), (rl, rr)))
    ref = jax.lax.conv_general_dilated(
        x_ref, conv.weight, window_strides=(S,), padding="VALID",
        dimension_numbers=("NCH", "OIH", "NCH")) + conv.bias[None, :, None]

    assert out.shape == ref.shape == (B, Cout, (T + S - 1) // S), (out.shape, ref.shape)
    assert out.dtype == jnp.bfloat16, out.dtype
    out_f32 = out.astype(jnp.float32)
    # bf16 MXU inputs / bf16 output (f32 accumulation) -> relaxed tolerance vs f32 ref
    max_err = float(jnp.max(jnp.abs(out_f32 - ref)))
    assert jnp.allclose(out_f32, ref, atol=5e-2, rtol=5e-2), max_err
    assert jnp.array_equal(out_lens, jnp.array([8, 6], dtype=jnp.int32))
    assert out_mask.shape == (B, out.shape[2])

    print("KERNEL_OK")
</pallas_src>

<mosaic_0001>
module attributes {stable_mosaic.version = 11 : i64} {
  func.func @_conv_tap_gemm_kernel(%arg0: i32, %arg1: i32, %arg2: memref<1x16x128xbf16, #tpu.memory_space<vmem>>, %arg3: memref<8x16xbf16, #tpu.memory_space<vmem>>, %arg4: memref<8x1xf32, #tpu.memory_space<vmem>>, %arg5: memref<1x8x128xbf16, #tpu.memory_space<vmem>>) attributes {dimension_semantics = [#tpu.dimension_semantics<parallel>, #tpu.dimension_semantics<parallel>], iteration_bounds = array<i64: 2, 1>, scalar_prefetch = 0 : i64, scratch_operands = 0 : i64, tpu.core_type = #tpu.core_type<tc>, window_params = [{transform_indices = @transform_0, window_bounds = array<i64: 1, 16, 128>}, {pipeline_mode = #tpu.pipeline_mode<synchronous>, transform_indices = @transform_1, window_bounds = array<i64: 8, 16>}, {pipeline_mode = #tpu.pipeline_mode<synchronous>, transform_indices = @transform_2, window_bounds = array<i64: 8, 1>}, {transform_indices = @transform_3, window_bounds = array<i64: 1, 8, 128>}]} {
    %c0 = arith.constant 0 : index
    %c0_0 = arith.constant 0 : index
    %0 = vector.load %arg3[%c0, %c0_0] : memref<8x16xbf16, #tpu.memory_space<vmem>>, vector<8x16xbf16>
    %c0_1 = arith.constant 0 : index
    %c0_2 = arith.constant 0 : index
    %c0_3 = arith.constant 0 : index
    %1 = vector.load %arg2[%c0_1, %c0_2, %c0_3] : memref<1x16x128xbf16, #tpu.memory_space<vmem>>, vector<1x16x128xbf16>
    %2 = vector.shape_cast %1 : vector<1x16x128xbf16> to vector<16x128xbf16>
    %cst = arith.constant dense<0.000000e+00> : vector<8x128xf32>
    %3 = tpu.matmul %0, %2, %cst {dimension_numbers = #tpu.dot_dimension_numbers<[1], [0], [0], [1], [0, 0, 1, 1], [], []>} : vector<8x16xbf16>, vector<16x128xbf16>, vector<8x128xf32> -> vector<8x128xf32>
    %c0_4 = arith.constant 0 : index
    %c0_5 = arith.constant 0 : index
    %4 = vector.load %arg4[%c0_4, %c0_5] : memref<8x1xf32, #tpu.memory_space<vmem>>, vector<8x1xf32>
    %5 = vector.broadcast %4 : vector<8x1xf32> to vector<8x128xf32>
    %6 = arith.addf %3, %5 : vector<8x128xf32>
    %7 = arith.truncf %6 : vector<8x128xf32> to vector<8x128xbf16>
    %c0_6 = arith.constant 0 : index
    %c0_7 = arith.constant 0 : index
    %c0_8 = arith.constant 0 : index
    %8 = vector.load %arg5[%c0_6, %c0_7, %c0_8] : memref<1x8x128xbf16, #tpu.memory_space<vmem>>, vector<1x8x128xbf16>
    %9 = vector.shape_cast %8 : vector<1x8x128xbf16> to vector<8x128xbf16>
    %10 = vector.shape_cast %7 : vector<8x128xbf16> to vector<1x8x128xbf16>
    tpu.vector_store %arg5[%c0_6, %c0_7, %c0_8], %10 {strides = array<i32>} : memref<1x8x128xbf16, #tpu.memory_space<vmem>>, vector<1x8x128xbf16>,
    return
  }
  func.func @transform_0(%arg0: i32, %arg1: i32) -> (i32, i32, i32) {
    %c0_i32 = arith.constant 0 : i32
    %c0_i32_0 = arith.constant 0 : i32
    return %arg0, %c0_i32, %arg1 : i32, i32, i32
  }
  func.func @transform_1(%arg0: i32, %arg1: i32) -> (i32, i32) {
    %c0_i32 = arith.constant 0 : i32
    %c0_i32_0 = arith.constant 0 : i32
    %c0_i32_1 = arith.constant 0 : i32
    return %c0_i32, %c0_i32_0 : i32, i32
  }
  func.func @transform_2(%arg0: i32, %arg1: i32) -> (i32, i32) {
    %c0_i32 = arith.constant 0 : i32
    %c0_i32_0 = arith.constant 0 : i32
    %c0_i32_1 = arith.constant 0 : i32
    return %c0_i32, %c0_i32_0 : i32, i32
  }
  func.func @transform_3(%arg0: i32, %arg1: i32) -> (i32, i32, i32) {
    %c0_i32 = arith.constant 0 : i32
    %c0_i32_0 = arith.constant 0 : i32
    return %arg0, %c0_i32, %arg1 : i32, i32, i32
  }
}

</mosaic_0001>

<bundles_post_ra>
// kernel: a_call__.1
= control target key start
LH: loop header
LB: loop body
LE: loop exit
PB: predicated region body
PF: predicated region fallthrough
CT: control target
= control target key end

     0   :  { %8 = vsyncpa [#allocation3], 0  ;;  %s647_s0 = inlined_call_operand.vmem [shape: bf16[2,16,128], index: 0, kind: input, shape index: {}]   ;;  %s648_s1 = inlined_call_operand.vmem [shape: bf16[8,16], index: 1, kind: input, shape index: {}]   ;;  %s649_s2 = inlined_call_operand.vmem [shape: f32[8,1], index: 2, kind: input, shape index: {}]   ;;  %s650_s3 = inlined_call_operand.hbm [shape: bf16[2,8,128], index: 3, kind: output, shape index: {}]  }
   0x1   :  { %10 = vsyncpa [#allocation3 + $0x1], 0  ;;  %s530_s12 = smov 0   ;;  %s532_s13 = smov 0  }
   0x2   :  { %s534_s14 = smov 0   ;;  %s536_s15 = smov 0  }
   0x3   :  { %s538_s16 = smov 0   ;;  %s540_s17 = smov 0  }
   0x4 LB: > { %s345_s18 = sadd.s32 4294967295, %s504_s17   ;;  %s346_s19 = sadd.s32 4294967294, %s504_s17   ;;  %s504_s17 = sphi %s540_s17, %s16_s17   ;;  %s500_s16 = sphi %s538_s16, %s657_s16   ;;  %s496_s15 = sphi %s536_s15, %s656_s15   ;;  %s492_s14 = sphi %s534_s14, %s655_s14   ;;  %s488_s13 = sphi %s532_s13, %s654_s13   ;;  %s484_s12 = sphi %s530_s12, %s653_s12  }
   0x5   : > { %s28_s20 = sadd.s32 1, %s500_s16  ;;  %s107_s21 = sadd.s32 1, %s492_s14 }
   0x6   : > { %p30_p0 = scmp.ge.s32.totalorder %s28_s20, 2  ;;  %p117_p1 = scmp.ne.s32.totalorder %s492_s14, %s488_s13 }
   0x7   : > { %p118_p2 = scmp.eq.s32.totalorder %s345_s18, 1  ;;  %p123_p3 = scmp.ne.s32.totalorder %s488_s13, %s484_s12 }
   0x8   : > { %s659_s20 = smov (%p30_p0, %s28_s20), 0  ;;  %p124_p5 = scmp.eq.s32.totalorder %s346_s19, 1 }
   0x9   : > { %p570_p4 = por %p118_p2, %p117_p1  ;;  %s102_s23 = ssub.s32 %s500_s16, %s659_s20 }
   0xa   : > { %p349_p6 = scmp.ge.s32.totalorder %s504_s17, 1  ;;  %p105_p7 = scmp.eq.s32.totalorder %s102_s23, 0 }
   0xb   : > { %p577_p8 = por %p124_p5, %p123_p3  ;;  %p159_p9 = scmp.lt.s32.totalorder %s504_s17, 3 }
   0xc   : > { %s583_s25 = scalar_select %p105_p7, %s492_s14, %s107_s21  }
   0xd   : > { %p160_p10 = pnand %p349_p6, %p159_p9 }
   0xe   : > { %p186_p11 = scmp.lt.s32.totalorder (!%p160_p10), %s496_s15, 1  ;;  %s183_s8 = sand.u32 (!%p160_p10), 1, %s488_s13  }
   0xf   : > { %163 = sbr.rel (%p160_p10) target bundleno = 239 (0xef), region = 32  ;;  %s350_s9 = sshll.u32 (!%p160_p10), %s183_s8, 2 }
  0x10   : > { %s356_s10 = sshll.u32 (!%p160_p10), %s496_s15, 6  ;;  %s185_s11 = scalar_lea.vmem (!%p160_p10), [#allocation2], %s350_s9 }
  0x11   : > { %s271_s18 = sshll.u32 (!%p160_p10), %s185_s11, 4  ;;  %s601_s23 = scalar_lea.hbm (!%p160_p10), %s650_s3, %s356_s10  ;;  %s603_s18 = int_to_ptr.vmem [resolvable:$true] %s271_s18 }
  0x12   : > { %s257_s26 = scalar_lea.sflag (!%p160_p10), [#allocation3], %s183_s8  ;;  %s509_s27 = smov (!%p160_p10), [#allocation2]  }
  0x14   : > { %v506_v0 = vmov 0.0   ;;  %vm507_vm0 = vmmov 0   ;;  %v198_v1 = vld [vmem:[%s649_s2] sm:$0xff]  ;;  %s187_s28 = scalar_select %p186_p11, %s496_s15, 1  ;;  %v508_v2 = vmov 0   ;;  %vm210_vm1 = vcmask 130048  }
  0x15   : > { %362 = vmatprep.subr.bf16.mxu0 %v506_v0  ;;  %364 = vmatprep.mubr.msk.bf16.mxu0 %vm507_vm0, %v506_v0  ;;  %v195_v4 = vld [vmem:[%s648_s1] sm:$0xf]  ;;  %s428_s15 = scalar_lea.vmem %s603_s18, 64 }
  0x16   : > { %426 = vset.pattern.permute.xlu0 %v508_v2  ;;  %s359_s29 = sshll.u32 %s187_s28, 3  ;;  %p429_p12 = scmp.ne.s32.totalorder %s603_s18, %s428_s15 }
  0x17   : > { %201 = vperm.xlu0 %426, %v198_v1   ;;  %s193_s5 = scalar_lea.vmem %s647_s0, %s359_s29  ;;  %s432_s28 = sshll.u32 %s509_s27, 4  ;;  %s433_s28 = int_to_ptr.vmem [resolvable:$false] %s432_s28 }
  0x18   : > { %v427_v3 = vld [vmem:[%s193_s5] sm:$0xff]   ;;  %p430_p13 = pnand %p429_p12, %p570_p4  ;;  %s434_s29 = scalar_lea.vmem %s433_s28, 128 }
  0x19   : > { %363 = vmatpush3.bf16.msra.mxu0 %v427_v3  ;;  %p435_p1 = scmp.lt.s32.totalorder %s603_s18, %s433_s28  ;;  %p436_p2 = scmp.lt.s32.totalorder %s434_s29, %s428_s15 }
  0x1a   : > { %p431_p0 = pneg %p430_p13 }
  0x1b   : > { %p437_p3 = por %p436_p2, %p435_p1 }
  0x1c   : > { %365 = vmatmul.mubr.msk.bf16.vlgmr.msra.gmra.mxu0 %vm210_vm1, %v195_v4 }
  0x1d   : > { %p438_p5 = pnand %p437_p3, %p431_p0 }
  0x92   : > { %v202_v5 = vpop.permute.xlu0 %201 }
  0xdc   : > { %v248_v6 = vpop.f32.mrf.mxu0 }
  0xdd   : > { %v249_v7 = vadd.f32 %v248_v6, %v202_v5 }
  0xde   : > { %v366_v8 = vpop.f32.mrf.mxu0 }
  0xdf   : > { %v254_v9 = vpack.c.bf16 %v249_v7, %v249_v7 }
  0xe0   : > { %v251_v10 = vpop.f32.mrf.mxu0 }
  0xe1   : > { %255 = vst [vmem:[%s185_s11] sm:$0xf] %v254_v9 }
  0xe2   : > { %v367_v11 = vpop.f32.mrf.mxu0 }
  0xe3   : > { %441 = shalt.err (!%p438_p5)
}
  0xe4   : > { %s442_s30 = scalar_lea.hbm %s601_s23, 64  ;;  %s446_s6 = scalar_lea.hbm %s650_s3, 128 }
  0xe5   : > { %p443_p6 = scmp.ne.s32.totalorder %s601_s23, %s442_s30  ;;  %p447_p10 = scmp.lt.s32.totalorder %s601_s23, %s650_s3 }
  0xe6   : > { %p448_p11 = scmp.lt.s32.totalorder %s446_s6, %s442_s30 }
  0xe7   : > { %p444_p7 = pnand %p443_p6, %p570_p4 }
  0xe8   : > { %p449_p12 = por %p448_p11, %p447_p10 }
  0xe9   : > { %p445_p9 = pneg %p444_p7 }
  0xeb   : > { %p450_p13 = pnand %p449_p12, %p445_p9 }
  0xed   : > { %453 = shalt.err (!%p450_p13)
}
  0xee   : > { %368 = dma.vmem_to_hbm [thread:$0]  (%p570_p4), %s603_s18, 64, %s601_s23, %s257_s26  }
  0xef PF: > { %p374_p0 = scmp.ge.s32.totalorder %s504_s17, 2  ;;  %s283_s9 = sand.u32 1, %s484_s12  }
  0xf0   : > { %s284_s10 = scalar_lea.sflag [#allocation3], %s283_s9 }
  0xf1   : > { %p371_p1 = pnand %p374_p0, %p577_p8 }
  0xf3   : > { %p372_p2 = pneg %p371_p1 }
  0xf5   : > { %479 = dma.done.wait (%p372_p2), %s284_s10, 64  }
  0xf6   : > { %481 = vsyncadd (%p372_p2), %s284_s10, 4294967232  ;;  %s16_s17 = sadd.s32 1, %s504_s17   ;;  %s653_s12 = smov %s488_s13 }
  0xf7   : > { %p13_p3 = scmp.ge.s32.totalorder %s16_s17, 4   ;;  %s654_s13 = smov %s492_s14 }
  0xf8   : > { %s655_s14 = smov %s583_s25  ;;  %s656_s15 = smov %s500_s16 }
  0xf9   : > { %s657_s16 = smov %s659_s20  ;;  %15 = sbr.rel (!%p13_p3) target bundleno = 4 (0x4), region = 67 }
  0xfe   :  { %289 = vsyncpa [#allocation3], 1 }
  0xff   :  { %291 = vsyncpa [#allocation3 + $0x1], 1 }

</bundles_post_ra>
